<compile_context>
chip_gen: v5e
topology: v5e:2x2
jax: 0.10.0
libtpu: 0.0.40
codegen_flags: <defaults>
</compile_context>

<pallas_src>
import functools

import jax
import jax.numpy as jnp
from jax.experimental import pallas as pl
from jax.experimental.pallas import tpu as pltpu


# --------------------------------------------------------------------------
# Small helpers
# --------------------------------------------------------------------------
def _round_up(v, m):
    return ((v + m - 1) // m) * m


def _pad2(a, rows, cols):
    return jnp.pad(a, ((0, rows - a.shape[0]), (0, cols - a.shape[1])))


def _chip_config():
    """Generation-aware VMEM budget / tiling constants."""
    kind = ""
    try:
        kind = jax.devices()[0].device_kind.lower()
    except Exception:
        pass
    is_v7 = "v7" in kind
    is_v5 = "v5" in kind

    cap = None
    try:
        info = pltpu.get_tpu_info()
        cap = int(getattr(info, "vmem_capacity_bytes", 0)) or None
    except Exception:
        cap = None
    if cap is None:
        cap = (64 << 20) if is_v7 else (128 << 20)
    if is_v7:
        # get_tpu_info may report per-chip capacity; v7x has 64 MiB per
        # TensorCore and both TCs run the pipeline under ("parallel",).
        cap = min(cap, 64 << 20)

    vmem_limit = (cap * 3) // 4
    if is_v7:
        vmem_limit = min(vmem_limit, 48 << 20)  # extra headroom for Mosaic scratch

    return {
        "vmem_limit": int(vmem_limit),
        "row_mult": 128 if is_v5 else 256,  # MXU-friendly row granularity
        "megacore": is_v7,                  # 2 TensorCores per chip
    }


# --------------------------------------------------------------------------
# Fused kernel: all four matmuls on one batch tile, weights resident in VMEM.
# --------------------------------------------------------------------------
def _autoencoder_kernel(x_ref,
                        we1_ref, be1_ref, we2_ref, be2_ref,
                        wd1_ref, bd1_ref, wd2_ref, bd2_ref,
                        out_ref):
    # Matmul operand dtype follows the (pre-cast) weights: f32 or bf16.
    mm_dtype = we1_ref.dtype

    def linear(a, w_ref, b_ref):
        # MXU matmul with f32 accumulation; bias add stays in f32 on the VPU.
        y = jnp.dot(a.astype(mm_dtype), w_ref[...],
                    preferred_element_type=jnp.float32)
        return y + b_ref[...]

    # ---- encoder ----
    h = jnp.maximum(linear(x_ref[...], we1_ref, be1_ref), 0.0)   # ReLU
    z = linear(h, we2_ref, be2_ref)
    # ---- decoder ----
    h2 = jnp.maximum(linear(z, wd1_ref, bd1_ref), 0.0)           # ReLU
    out_ref[...] = linear(h2, wd2_ref, bd2_ref).astype(out_ref.dtype)


def _plan_fused_tile(n_rows, d_in_p, hid_p, lat_p, *, w_bytes, x_bytes,
                     budget, row_mult, row_align, megacore):
    """Pick the batch tile for the fused path, or None -> layer-wise fallback."""
    # Resident (single-buffered) weights + f32 biases.
    weight_bytes = (w_bytes * (2 * d_in_p * hid_p + 2 * hid_p * lat_p)
                    + 4 * (2 * hid_p + lat_p + d_in_p))
    if weight_bytes > budget // 2:
        return None  # weights cannot stay grid-invariant -> layer-wise path

    bytes_per_row = (2 * x_bytes * d_in_p        # double-buffered x tile
                     + 2 * 4 * d_in_p            # double-buffered f32 out tile
                     + 4 * (2 * hid_p + lat_p))  # f32 intermediates h, z, h2
    avail = budget - weight_bytes
    n_aligned = _round_up(max(int(n_rows), 1), row_align)

    if n_aligned * bytes_per_row <= avail:
        # Whole (padded) batch fits: single grid step. On v7x split into
        # exactly two chunks (one per TensorCore) only when each half >= 256.
        if megacore and n_aligned >= 512:
            return _round_up(-(-n_aligned // 2), row_align)
        return n_aligned

    # VMEM forces a split: biggest MXU-friendly tile that fits, never below
    # row_mult rows (128 on v5e, 256 on v6e/v7x).
    tile = max(((avail // bytes_per_row) // row_mult) * row_mult, row_mult)
    return min(tile, 2048, _round_up(n_aligned, row_mult))


def _fused_call(xp, wb, tile_m, grid, n_pad, d_in_p, out_dtype,
                vmem_limit_bytes, single_buffer_weights):
    def const_spec(shape):
        # Grid-invariant block (same block index every step => DMA'd once).
        if single_buffer_weights:
            return pl.BlockSpec(shape, lambda i: (0,) * len(shape),
                                pipeline_mode=pl.Buffered(1))
        return pl.BlockSpec(shape, lambda i: (0,) * len(shape))

    return pl.pallas_call(
        _autoencoder_kernel,
        out_shape=jax.ShapeDtypeStruct((n_pad, d_in_p), out_dtype),
        grid_spec=pltpu.PrefetchScalarGridSpec(
            num_scalar_prefetch=0,
            grid=grid,
            in_specs=[pl.BlockSpec((tile_m, d_in_p), lambda i: (i, 0))]
                     + [const_spec(a.shape) for a in wb],
            out_specs=pl.BlockSpec((tile_m, d_in_p), lambda i: (i, 0)),
        ),
        compiler_params=pltpu.CompilerParams(
            dimension_semantics=("parallel",),   # batch tiles -> both TCs on v7x
            vmem_limit_bytes=int(vmem_limit_bytes)),
    )(xp, *wb)


# --------------------------------------------------------------------------
# Layer-wise fallback: per-layer tiled matmul (+bias, optional ReLU).
# Used when the resident weight set does not fit the VMEM budget.
# --------------------------------------------------------------------------
def _linear_kernel(x_ref, w_ref, b_ref, o_ref, acc_ref, *, apply_relu):
    k = pl.program_id(2)

    @pl.when(k == 0)
    def _():
        acc_ref[...] = jnp.zeros_like(acc_ref)

    acc_ref[...] += jnp.dot(x_ref[...], w_ref[...],
                            preferred_element_type=jnp.float32)

    @pl.when(k == pl.num_programs(2) - 1)
    def _():
        y = acc_ref[...] + b_ref[...]
        if apply_relu:
            y = jnp.maximum(y, 0.0)
        o_ref[...] = y.astype(o_ref.dtype)


def _pallas_linear(x, w, b, apply_relu, *, vmem_limit_bytes,
                   tm=256, tn=512, tk=512):
    M, K = x.shape
    _, N = w.shape
    tm = min(tm, _round_up(M, 8))
    tn = min(tn, _round_up(N, 128))
    tk = min(tk, _round_up(K, 128))
    M_p = pl.cdiv(M, tm) * tm
    K_p = pl.cdiv(K, tk) * tk
    N_p = pl.cdiv(N, tn) * tn

    xp = _pad2(x, M_p, K_p)
    wp = _pad2(w, K_p, N_p)
    bp = _pad2(b, 1, N_p)
    grid = (M_p // tm, N_p // tn, K_p // tk)

    out = pl.pallas_call(
        functools.partial(_linear_kernel, apply_relu=apply_relu),
        out_shape=jax.ShapeDtypeStruct((M_p, N_p), x.dtype),
        grid_spec=pltpu.PrefetchScalarGridSpec(
            num_scalar_prefetch=0,
            grid=grid,
            in_specs=[pl.BlockSpec((tm, tk), lambda i, j, k: (i, k)),
                      pl.BlockSpec((tk, tn), lambda i, j, k: (k, j)),
                      pl.BlockSpec((1, tn), lambda i, j, k: (0, j))],
            out_specs=pl.BlockSpec((tm, tn), lambda i, j, k: (i, j)),
            scratch_shapes=[pltpu.VMEM((tm, tn), jnp.float32)],
        ),
        compiler_params=pltpu.CompilerParams(
            dimension_semantics=("parallel", "parallel", "arbitrary"),
            vmem_limit_bytes=int(vmem_limit_bytes)),
    )(xp, wp, bp)
    return out[:M, :N]


def _layerwise_forward(x, p, *, vmem_limit_bytes):
    h = _pallas_linear(x, p["we1"], p["be1"], True,
                       vmem_limit_bytes=vmem_limit_bytes)
    z = _pallas_linear(h, p["we2"], p["be2"], False,
                       vmem_limit_bytes=vmem_limit_bytes)
    h2 = _pallas_linear(z, p["wd1"], p["bd1"], True,
                        vmem_limit_bytes=vmem_limit_bytes)
    return _pallas_linear(h2, p["wd2"], p["bd2"], False,
                          vmem_limit_bytes=vmem_limit_bytes)


# --------------------------------------------------------------------------
# Public forward
# --------------------------------------------------------------------------
def autoencoder_forward(x, params, *, tile_m=None, use_bf16_matmul=False,
                        vmem_limit_bytes=None, force_layerwise=False):
    """Fused autoencoder forward as a single Pallas kernel (with fallback).

    x      : (N, d_in) float32
    params : dict with weights (in, out) and biases (1, out)
    """
    N, d_in = x.shape
    hidden = params["we1"].shape[1]
    latent = params["we2"].shape[1]

    cfg = _chip_config()
    if vmem_limit_bytes is None:
        vmem_limit_bytes = cfg["vmem_limit"]
    budget = (int(vmem_limit_bytes) * 2) // 3   # planning headroom

    # Pad feature dims to the 128-lane width (exact for Linear+ReLU stacks):
    # lane-dense loads/stores, full-lane MXU operands, no vst.msk.
    d_in_p = _round_up(d_in, 128)
    hid_p = _round_up(hidden, 128)
    lat_p = _round_up(latent, 128)
    # TODO(synk): latent could be padded only to a sublane multiple (8) since z
    # never leaves the kernel; kept at 128 here to avoid a Mosaic relayout.

    w_dtype = jnp.bfloat16 if use_bf16_matmul else jnp.float32
    x_dtype = jnp.bfloat16 if use_bf16_matmul else x.dtype
    row_align = 16 if use_bf16_matmul else 8    # bf16 sublane packing

    if tile_m is None and not force_layerwise:
        tile_m = _plan_fused_tile(
            N, d_in_p, hid_p, lat_p,
            w_bytes=jnp.dtype(w_dtype).itemsize,
            x_bytes=jnp.dtype(x_dtype).itemsize,
            budget=budget,
            row_mult=cfg["row_mult"],
            row_align=row_align,
            megacore=cfg["megacore"])

    if force_layerwise or tile_m is None:
        # Grid-invariant weights don't fit VMEM: per-layer tiled matmul path.
        return _layerwise_forward(x, params,
                                  vmem_limit_bytes=int(vmem_limit_bytes))

    tile_m = max(_round_up(int(tile_m), row_align), row_align)
    n_pad = pl.cdiv(N, tile_m) * tile_m
    grid = (n_pad // tile_m,)

    # Zero-pad batch rows (to a tile multiple) and feature columns (to 128).
    xp = _pad2(x, n_pad, d_in_p).astype(x_dtype)
    we1 = _pad2(params["we1"], d_in_p, hid_p).astype(w_dtype)
    we2 = _pad2(params["we2"], hid_p, lat_p).astype(w_dtype)
    wd1 = _pad2(params["wd1"], lat_p, hid_p).astype(w_dtype)
    wd2 = _pad2(params["wd2"], hid_p, d_in_p).astype(w_dtype)
    be1 = _pad2(params["be1"], 1, hid_p).astype(jnp.float32)
    be2 = _pad2(params["be2"], 1, lat_p).astype(jnp.float32)
    bd1 = _pad2(params["bd1"], 1, hid_p).astype(jnp.float32)
    bd2 = _pad2(params["bd2"], 1, d_in_p).astype(jnp.float32)
    wb = (we1, be1, we2, be2, wd1, bd1, wd2, bd2)

    try:
        out = _fused_call(xp, wb, tile_m, grid, n_pad, d_in_p, x.dtype,
                          vmem_limit_bytes, single_buffer_weights=True)
    except Exception:
        # pl.Buffered(1) rejected on this jax/Mosaic version -> default buffers.
        out = _fused_call(xp, wb, tile_m, grid, n_pad, d_in_p, x.dtype,
                          vmem_limit_bytes, single_buffer_weights=False)

    return out[:N, :d_in]


# --------------------------------------------------------------------------
# Params + reference
# --------------------------------------------------------------------------
def init_params(key, d_in, hidden, latent, dtype=jnp.float32):
    """Deterministic PyTorch-Linear-style init (uniform(-1/sqrt(fan_in), +))."""
    def linear(k, fan_in, fan_out):
        kw, kb = jax.random.split(k)
        bound = 1.0 / jnp.sqrt(jnp.asarray(fan_in, dtype))
        w = jax.random.uniform(kw, (fan_in, fan_out), dtype, -bound, bound)
        b = jax.random.uniform(kb, (1, fan_out), dtype, -bound, bound)
        return w, b

    k1, k2, k3, k4 = jax.random.split(key, 4)
    we1, be1 = linear(k1, d_in, hidden)     # encoder Linear 1
    we2, be2 = linear(k2, hidden, latent)   # encoder Linear 2
    wd1, bd1 = linear(k3, latent, hidden)   # decoder Linear 1
    wd2, bd2 = linear(k4, hidden, d_in)     # decoder Linear 2
    return dict(we1=we1, be1=be1, we2=we2, be2=be2,
                wd1=wd1, bd1=bd1, wd2=wd2, bd2=bd2)


def reference_forward(x, p):
    """Pure-JAX reference (same semantics as the PyTorch module forward)."""
    h = jnp.maximum(x @ p["we1"] + p["be1"], 0.0)
    z = h @ p["we2"] + p["be2"]
    h2 = jnp.maximum(z @ p["wd1"] + p["bd1"], 0.0)
    return h2 @ p["wd2"] + p["bd2"]


# TODO(synk): fit()/encode()/decode() (Adam training loop, StandardScaler) are
# host-side training utilities, not part of the module forward; not ported.

if __name__ == "__main__":
    key = jax.random.PRNGKey(0)
    k_x, k_p = jax.random.split(key)

    batch, d_in, hidden, latent = 32, 16, 32, 8
    x = jax.random.normal(k_x, (batch, d_in), dtype=jnp.float32)
    params = init_params(k_p, d_in, hidden, latent)
    ref = reference_forward(x, params)

    # Fused f32 path (exact semantics of the PyTorch forward).
    out = jax.block_until_ready(autoencoder_forward(x, params))
    assert out.shape == (batch, d_in)
    assert jnp.allclose(out, ref, atol=1e-4, rtol=1e-4), "f32 fused path mismatch"

    # bf16-matmul path (bf16 x/weights, f32 accumulation, f32 output).
    out_bf16 = jax.block_until_ready(
        autoencoder_forward(x, params, use_bf16_matmul=True))
    assert out_bf16.shape == (batch, d_in)
    assert jnp.allclose(out_bf16, ref, atol=1e-1, rtol=1e-1), "bf16 path mismatch"

    # Layer-wise fallback (used automatically when weights exceed VMEM budget).
    out_lw = jax.block_until_ready(
        autoencoder_forward(x, params, force_layerwise=True))
    assert out_lw.shape == (batch, d_in)
    assert jnp.allclose(out_lw, ref, atol=1e-4, rtol=1e-4), "layer-wise mismatch"

    print("KERNEL_OK")
</pallas_src>

<mosaic_0001>
module attributes {stable_mosaic.version = 11 : i64} {
  func.func @_autoencoder_kernel(%arg0: i32, %arg1: memref<32x128xf32, #tpu.memory_space<vmem>>, %arg2: memref<128x128xf32, #tpu.memory_space<vmem>>, %arg3: memref<1x128xf32, #tpu.memory_space<vmem>>, %arg4: memref<128x128xf32, #tpu.memory_space<vmem>>, %arg5: memref<1x128xf32, #tpu.memory_space<vmem>>, %arg6: memref<128x128xf32, #tpu.memory_space<vmem>>, %arg7: memref<1x128xf32, #tpu.memory_space<vmem>>, %arg8: memref<128x128xf32, #tpu.memory_space<vmem>>, %arg9: memref<1x128xf32, #tpu.memory_space<vmem>>, %arg10: memref<32x128xf32, #tpu.memory_space<vmem>>) attributes {dimension_semantics = [#tpu.dimension_semantics<parallel>], iteration_bounds = array<i64: 1>, scalar_prefetch = 0 : i64, scratch_operands = 0 : i64, tpu.core_type = #tpu.core_type<tc>, window_params = [{transform_indices = @transform_0, window_bounds = array<i64: 32, 128>}, {pipeline_mode = #tpu.pipeline_mode<synchronous>, transform_indices = @transform_1, window_bounds = array<i64: 128, 128>}, {pipeline_mode = #tpu.pipeline_mode<synchronous>, transform_indices = @transform_2, window_bounds = array<i64: 1, 128>}, {pipeline_mode = #tpu.pipeline_mode<synchronous>, transform_indices = @transform_3, window_bounds = array<i64: 128, 128>}, {pipeline_mode = #tpu.pipeline_mode<synchronous>, transform_indices = @transform_4, window_bounds = array<i64: 1, 128>}, {pipeline_mode = #tpu.pipeline_mode<synchronous>, transform_indices = @transform_5, window_bounds = array<i64: 128, 128>}, {pipeline_mode = #tpu.pipeline_mode<synchronous>, transform_indices = @transform_6, window_bounds = array<i64: 1, 128>}, {pipeline_mode = #tpu.pipeline_mode<synchronous>, transform_indices = @transform_7, window_bounds = array<i64: 128, 128>}, {pipeline_mode = #tpu.pipeline_mode<synchronous>, transform_indices = @transform_8, window_bounds = array<i64: 1, 128>}, {transform_indices = @transform_9, window_bounds = array<i64: 32, 128>}]} {
    %c0 = arith.constant 0 : index
    %c0_0 = arith.constant 0 : index
    %0 = vector.load %arg1[%c0, %c0_0] : memref<32x128xf32, #tpu.memory_space<vmem>>, vector<32x128xf32>
    %c0_1 = arith.constant 0 : index
    %c0_2 = arith.constant 0 : index
    %1 = vector.load %arg2[%c0_1, %c0_2] : memref<128x128xf32, #tpu.memory_space<vmem>>, vector<128x128xf32>
    %cst = arith.constant dense<0.000000e+00> : vector<32x128xf32>
    %2 = tpu.matmul %0, %1, %cst {dimension_numbers = #tpu.dot_dimension_numbers<[1], [0], [0], [1], [0, 0, 1, 1], [], []>} : vector<32x128xf32>, vector<128x128xf32>, vector<32x128xf32> -> vector<32x128xf32>
    %c0_3 = arith.constant 0 : index
    %c0_4 = arith.constant 0 : index
    %3 = vector.load %arg3[%c0_3, %c0_4] : memref<1x128xf32, #tpu.memory_space<vmem>>, vector<1x128xf32>
    %4 = vector.broadcast %3 : vector<1x128xf32> to vector<32x128xf32>
    %5 = arith.addf %2, %4 : vector<32x128xf32>
    %cst_5 = arith.constant 0.000000e+00 : f32
    %6 = vector.broadcast %cst_5 : f32 to vector<32x128xf32>
    %7 = arith.maximumf %5, %6 : vector<32x128xf32>
    %c0_6 = arith.constant 0 : index
    %c0_7 = arith.constant 0 : index
    %8 = vector.load %arg4[%c0_6, %c0_7] : memref<128x128xf32, #tpu.memory_space<vmem>>, vector<128x128xf32>
    %cst_8 = arith.constant dense<0.000000e+00> : vector<32x128xf32>
    %9 = tpu.matmul %7, %8, %cst_8 {dimension_numbers = #tpu.dot_dimension_numbers<[1], [0], [0], [1], [0, 0, 1, 1], [], []>} : vector<32x128xf32>, vector<128x128xf32>, vector<32x128xf32> -> vector<32x128xf32>
    %c0_9 = arith.constant 0 : index
    %c0_10 = arith.constant 0 : index
    %10 = vector.load %arg5[%c0_9, %c0_10] : memref<1x128xf32, #tpu.memory_space<vmem>>, vector<1x128xf32>
    %11 = vector.broadcast %10 : vector<1x128xf32> to vector<32x128xf32>
    %12 = arith.addf %9, %11 : vector<32x128xf32>
    %c0_11 = arith.constant 0 : index
    %c0_12 = arith.constant 0 : index
    %13 = vector.load %arg6[%c0_11, %c0_12] : memref<128x128xf32, #tpu.memory_space<vmem>>, vector<128x128xf32>
    %cst_13 = arith.constant dense<0.000000e+00> : vector<32x128xf32>
    %14 = tpu.matmul %12, %13, %cst_13 {dimension_numbers = #tpu.dot_dimension_numbers<[1], [0], [0], [1], [0, 0, 1, 1], [], []>} : vector<32x128xf32>, vector<128x128xf32>, vector<32x128xf32> -> vector<32x128xf32>
    %c0_14 = arith.constant 0 : index
    %c0_15 = arith.constant 0 : index
    %15 = vector.load %arg7[%c0_14, %c0_15] : memref<1x128xf32, #tpu.memory_space<vmem>>, vector<1x128xf32>
    %16 = vector.broadcast %15 : vector<1x128xf32> to vector<32x128xf32>
    %17 = arith.addf %14, %16 : vector<32x128xf32>
    %cst_16 = arith.constant 0.000000e+00 : f32
    %18 = vector.broadcast %cst_16 : f32 to vector<32x128xf32>
    %19 = arith.maximumf %17, %18 : vector<32x128xf32>
    %c0_17 = arith.constant 0 : index
    %c0_18 = arith.constant 0 : index
    %20 = vector.load %arg8[%c0_17, %c0_18] : memref<128x128xf32, #tpu.memory_space<vmem>>, vector<128x128xf32>
    %cst_19 = arith.constant dense<0.000000e+00> : vector<32x128xf32>
    %21 = tpu.matmul %19, %20, %cst_19 {dimension_numbers = #tpu.dot_dimension_numbers<[1], [0], [0], [1], [0, 0, 1, 1], [], []>} : vector<32x128xf32>, vector<128x128xf32>, vector<32x128xf32> -> vector<32x128xf32>
    %c0_20 = arith.constant 0 : index
    %c0_21 = arith.constant 0 : index
    %22 = vector.load %arg9[%c0_20, %c0_21] : memref<1x128xf32, #tpu.memory_space<vmem>>, vector<1x128xf32>
    %23 = vector.broadcast %22 : vector<1x128xf32> to vector<32x128xf32>
    %24 = arith.addf %21, %23 : vector<32x128xf32>
    %c0_22 = arith.constant 0 : index
    %c0_23 = arith.constant 0 : index
    %25 = vector.load %arg10[%c0_22, %c0_23] : memref<32x128xf32, #tpu.memory_space<vmem>>, vector<32x128xf32>
    tpu.vector_store %arg10[%c0_22, %c0_23], %24 {strides = array<i32>} : memref<32x128xf32, #tpu.memory_space<vmem>>, vector<32x128xf32>,
    return
  }
  func.func @transform_0(%arg0: i32) -> (i32, i32) {
    %c0_i32 = arith.constant 0 : i32
    %c0_i32_0 = arith.constant 0 : i32
    return %arg0, %c0_i32 : i32, i32
  }
  func.func @transform_1(%arg0: i32) -> (i32, i32) {
    %c0_i32 = arith.constant 0 : i32
    %c0_i32_0 = arith.constant 0 : i32
    %c0_i32_1 = arith.constant 0 : i32
    return %c0_i32, %c0_i32_0 : i32, i32
  }
  func.func @transform_2(%arg0: i32) -> (i32, i32) {
    %c0_i32 = arith.constant 0 : i32
    %c0_i32_0 = arith.constant 0 : i32
    %c0_i32_1 = arith.constant 0 : i32
    return %c0_i32, %c0_i32_0 : i32, i32
  }
  func.func @transform_3(%arg0: i32) -> (i32, i32) {
    %c0_i32 = arith.constant 0 : i32
    %c0_i32_0 = arith.constant 0 : i32
    %c0_i32_1 = arith.constant 0 : i32
    return %c0_i32, %c0_i32_0 : i32, i32
  }
  func.func @transform_4(%arg0: i32) -> (i32, i32) {
    %c0_i32 = arith.constant 0 : i32
    %c0_i32_0 = arith.constant 0 : i32
    %c0_i32_1 = arith.constant 0 : i32
    return %c0_i32, %c0_i32_0 : i32, i32
  }
  func.func @transform_5(%arg0: i32) -> (i32, i32) {
    %c0_i32 = arith.constant 0 : i32
    %c0_i32_0 = arith.constant 0 : i32
    %c0_i32_1 = arith.constant 0 : i32
    return %c0_i32, %c0_i32_0 : i32, i32
  }
  func.func @transform_6(%arg0: i32) -> (i32, i32) {
    %c0_i32 = arith.constant 0 : i32
    %c0_i32_0 = arith.constant 0 : i32
    %c0_i32_1 = arith.constant 0 : i32
    return %c0_i32, %c0_i32_0 : i32, i32
  }
  func.func @transform_7(%arg0: i32) -> (i32, i32) {
    %c0_i32 = arith.constant 0 : i32
    %c0_i32_0 = arith.constant 0 : i32
    %c0_i32_1 = arith.constant 0 : i32
    return %c0_i32, %c0_i32_0 : i32, i32
  }
  func.func @transform_8(%arg0: i32) -> (i32, i32) {
    %c0_i32 = arith.constant 0 : i32
    %c0_i32_0 = arith.constant 0 : i32
    %c0_i32_1 = arith.constant 0 : i32
    return %c0_i32, %c0_i32_0 : i32, i32
  }
  func.func @transform_9(%arg0: i32) -> (i32, i32) {
    %c0_i32 = arith.constant 0 : i32
    %c0_i32_0 = arith.constant 0 : i32
    return %arg0, %c0_i32 : i32, i32
  }
}

module attributes {stable_mosaic.version = 11 : i64} {
  func.func @_autoencoder_kernel(%arg0: i32, %arg1: memref<32x128xf32, #tpu.memory_space<vmem>>, %arg2: memref<128x128xf32, #tpu.memory_space<vmem>>, %arg3: memref<1x128xf32, #tpu.memory_space<vmem>>, %arg4: memref<128x128xf32, #tpu.memory_space<vmem>>, %arg5: memref<1x128xf32, #tpu.memory_space<vmem>>, %arg6: memref<128x128xf32, #tpu.memory_space<vmem>>, %arg7: memref<1x128xf32, #tpu.memory_space<vmem>>, %arg8: memref<128x128xf32, #tpu.memory_space<vmem>>, %arg9: memref<1x128xf32, #tpu.memory_space<vmem>>, %arg10: memref<32x128xf32, #tpu.memory_space<vmem>>) attributes {dimension_semantics = [#tpu.dimension_semantics<parallel>], iteration_bounds = array<i64: 1>, scalar_prefetch = 0 : i64, scratch_operands = 0 : i64, tpu.core_type = #tpu.core_type<tc>, window_params = [{transform_indices = @transform_0, window_bounds = array<i64: 32, 128>}, {pipeline_mode = #tpu.pipeline_mode<synchronous>, transform_indices = @transform_1, window_bounds = array<i64: 128, 128>}, {pipeline_mode = #tpu.pipeline_mode<synchronous>, transform_indices = @transform_2, window_bounds = array<i64: 1, 128>}, {pipeline_mode = #tpu.pipeline_mode<synchronous>, transform_indices = @transform_3, window_bounds = array<i64: 128, 128>}, {pipeline_mode = #tpu.pipeline_mode<synchronous>, transform_indices = @transform_4, window_bounds = array<i64: 1, 128>}, {pipeline_mode = #tpu.pipeline_mode<synchronous>, transform_indices = @transform_5, window_bounds = array<i64: 128, 128>}, {pipeline_mode = #tpu.pipeline_mode<synchronous>, transform_indices = @transform_6, window_bounds = array<i64: 1, 128>}, {pipeline_mode = #tpu.pipeline_mode<synchronous>, transform_indices = @transform_7, window_bounds = array<i64: 128, 128>}, {pipeline_mode = #tpu.pipeline_mode<synchronous>, transform_indices = @transform_8, window_bounds = array<i64: 1, 128>}, {transform_indices = @transform_9, window_bounds = array<i64: 32, 128>}]} {
    %c0 = arith.constant 0 : index
    %c0_0 = arith.constant 0 : index
    %0 = vector.load %arg1[%c0, %c0_0] : memref<32x128xf32, #tpu.memory_space<vmem>>, vector<32x128xf32>
    %c0_1 = arith.constant 0 : index
    %c0_2 = arith.constant 0 : index
    %1 = vector.load %arg2[%c0_1, %c0_2] : memref<128x128xf32, #tpu.memory_space<vmem>>, vector<128x128xf32>
    %cst = arith.constant dense<0.000000e+00> : vector<32x128xf32>
    %2 = tpu.matmul %0, %1, %cst {dimension_numbers = #tpu.dot_dimension_numbers<[1], [0], [0], [1], [0, 0, 1, 1], [], []>} : vector<32x128xf32>, vector<128x128xf32>, vector<32x128xf32> -> vector<32x128xf32>
    %c0_3 = arith.constant 0 : index
    %c0_4 = arith.constant 0 : index
    %3 = vector.load %arg3[%c0_3, %c0_4] : memref<1x128xf32, #tpu.memory_space<vmem>>, vector<1x128xf32>
    %4 = vector.broadcast %3 : vector<1x128xf32> to vector<32x128xf32>
    %5 = arith.addf %2, %4 : vector<32x128xf32>
    %cst_5 = arith.constant 0.000000e+00 : f32
    %6 = vector.broadcast %cst_5 : f32 to vector<32x128xf32>
    %7 = arith.maximumf %5, %6 : vector<32x128xf32>
    %c0_6 = arith.constant 0 : index
    %c0_7 = arith.constant 0 : index
    %8 = vector.load %arg4[%c0_6, %c0_7] : memref<128x128xf32, #tpu.memory_space<vmem>>, vector<128x128xf32>
    %cst_8 = arith.constant dense<0.000000e+00> : vector<32x128xf32>
    %9 = tpu.matmul %7, %8, %cst_8 {dimension_numbers = #tpu.dot_dimension_numbers<[1], [0], [0], [1], [0, 0, 1, 1], [], []>} : vector<32x128xf32>, vector<128x128xf32>, vector<32x128xf32> -> vector<32x128xf32>
    %c0_9 = arith.constant 0 : index
    %c0_10 = arith.constant 0 : index
    %10 = vector.load %arg5[%c0_9, %c0_10] : memref<1x128xf32, #tpu.memory_space<vmem>>, vector<1x128xf32>
    %11 = vector.broadcast %10 : vector<1x128xf32> to vector<32x128xf32>
    %12 = arith.addf %9, %11 : vector<32x128xf32>
    %c0_11 = arith.constant 0 : index
    %c0_12 = arith.constant 0 : index
    %13 = vector.load %arg6[%c0_11, %c0_12] : memref<128x128xf32, #tpu.memory_space<vmem>>, vector<128x128xf32>
    %cst_13 = arith.constant dense<0.000000e+00> : vector<32x128xf32>
    %14 = tpu.matmul %12, %13, %cst_13 {dimension_numbers = #tpu.dot_dimension_numbers<[1], [0], [0], [1], [0, 0, 1, 1], [], []>} : vector<32x128xf32>, vector<128x128xf32>, vector<32x128xf32> -> vector<32x128xf32>
    %c0_14 = arith.constant 0 : index
    %c0_15 = arith.constant 0 : index
    %15 = vector.load %arg7[%c0_14, %c0_15] : memref<1x128xf32, #tpu.memory_space<vmem>>, vector<1x128xf32>
    %16 = vector.broadcast %15 : vector<1x128xf32> to vector<32x128xf32>
    %17 = arith.addf %14, %16 : vector<32x128xf32>
    %cst_16 = arith.constant 0.000000e+00 : f32
    %18 = vector.broadcast %cst_16 : f32 to vector<32x128xf32>
    %19 = arith.maximumf %17, %18 : vector<32x128xf32>
    %c0_17 = arith.constant 0 : index
    %c0_18 = arith.constant 0 : index
    %20 = vector.load %arg8[%c0_17, %c0_18] : memref<128x128xf32, #tpu.memory_space<vmem>>, vector<128x128xf32>
    %cst_19 = arith.constant dense<0.000000e+00> : vector<32x128xf32>
    %21 = tpu.matmul %19, %20, %cst_19 {dimension_numbers = #tpu.dot_dimension_numbers<[1], [0], [0], [1], [0, 0, 1, 1], [], []>} : vector<32x128xf32>, vector<128x128xf32>, vector<32x128xf32> -> vector<32x128xf32>
    %c0_20 = arith.constant 0 : index
    %c0_21 = arith.constant 0 : index
    %22 = vector.load %arg9[%c0_20, %c0_21] : memref<1x128xf32, #tpu.memory_space<vmem>>, vector<1x128xf32>
    %23 = vector.broadcast %22 : vector<1x128xf32> to vector<32x128xf32>
    %24 = arith.addf %21, %23 : vector<32x128xf32>
    %c0_22 = arith.constant 0 : index
    %c0_23 = arith.constant 0 : index
    %25 = vector.load %arg10[%c0_22, %c0_23] : memref<32x128xf32, #tpu.memory_space<vmem>>, vector<32x128xf32>
    tpu.vector_store %arg10[%c0_22, %c0_23], %24 {strides = array<i32>} : memref<32x128xf32, #tpu.memory_space<vmem>>, vector<32x128xf32>,
    return
  }
  func.func @transform_0(%arg0: i32) -> (i32, i32) {
    %c0_i32 = arith.constant 0 : i32
    %c0_i32_0 = arith.constant 0 : i32
    return %arg0, %c0_i32 : i32, i32
  }
  func.func @transform_1(%arg0: i32) -> (i32, i32) {
    %c0_i32 = arith.constant 0 : i32
    %c0_i32_0 = arith.constant 0 : i32
    %c0_i32_1 = arith.constant 0 : i32
    return %c0_i32, %c0_i32_0 : i32, i32
  }
  func.func @transform_2(%arg0: i32) -> (i32, i32) {
    %c0_i32 = arith.constant 0 : i32
    %c0_i32_0 = arith.constant 0 : i32
    %c0_i32_1 = arith.constant 0 : i32
    return %c0_i32, %c0_i32_0 : i32, i32
  }
  func.func @transform_3(%arg0: i32) -> (i32, i32) {
    %c0_i32 = arith.constant 0 : i32
    %c0_i32_0 = arith.constant 0 : i32
    %c0_i32_1 = arith.constant 0 : i32
    return %c0_i32, %c0_i32_0 : i32, i32
  }
  func.func @transform_4(%arg0: i32) -> (i32, i32) {
    %c0_i32 = arith.constant 0 : i32
    %c0_i32_0 = arith.constant 0 : i32
    %c0_i32_1 = arith.constant 0 : i32
    return %c0_i32, %c0_i32_0 : i32, i32
  }
  func.func @transform_5(%arg0: i32) -> (i32, i32) {
    %c0_i32 = arith.constant 0 : i32
    %c0_i32_0 = arith.constant 0 : i32
    %c0_i32_1 = arith.constant 0 : i32
    return %c0_i32, %c0_i32_0 : i32, i32
  }
  func.func @transform_6(%arg0: i32) -> (i32, i32) {
    %c0_i32 = arith.constant 0 : i32
    %c0_i32_0 = arith.constant 0 : i32
    %c0_i32_1 = arith.constant 0 : i32
    return %c0_i32, %c0_i32_0 : i32, i32
  }
  func.func @transform_7(%arg0: i32) -> (i32, i32) {
    %c0_i32 = arith.constant 0 : i32
    %c0_i32_0 = arith.constant 0 : i32
    %c0_i32_1 = arith.constant 0 : i32
    return %c0_i32, %c0_i32_0 : i32, i32
  }
  func.func @transform_8(%arg0: i32) -> (i32, i32) {
    %c0_i32 = arith.constant 0 : i32
    %c0_i32_0 = arith.constant 0 : i32
    %c0_i32_1 = arith.constant 0 : i32
    return %c0_i32, %c0_i32_0 : i32, i32
  }
  func.func @transform_9(%arg0: i32) -> (i32, i32) {
    %c0_i32 = arith.constant 0 : i32
    %c0_i32_0 = arith.constant 0 : i32
    return %arg0, %c0_i32 : i32, i32
  }
}

</mosaic_0001>

<bundles_post_ra>
// kernel: tpu_custom_call.1
= control target key start
LH: loop header
LB: loop body
LE: loop exit
PB: predicated region body
PF: predicated region fallthrough
CT: control target
= control target key end

     0   :  { %14 = vsyncpa [#allocation3], 0  ;;  %s614_s0 = inlined_call_operand.hbm [shape: f32[32,128], index: 0, kind: input, shape index: {}]   ;;  %s615_s1 = inlined_call_operand.hbm [shape: f32[128,128], index: 1, kind: input, shape index: {}]   ;;  %s616_s2 = inlined_call_operand.vmem [shape: f32[1,128], index: 2, kind: input, shape index: {}]   ;;  %s617_s3 = inlined_call_operand.hbm [shape: f32[128,128], index: 3, kind: input, shape index: {}]   ;;  %s618_s4 = inlined_call_operand.vmem [shape: f32[1,128], index: 4, kind: input, shape index: {}]   ;;  %s619_s5 = inlined_call_operand.hbm [shape: f32[128,128], index: 5, kind: input, shape index: {}]   ;;  %s620_s6 = inlined_call_operand.vmem [shape: f32[1,128], index: 6, kind: input, shape index: {}]   ;;  %s621_s7 = inlined_call_operand.hbm [shape: f32[128,128], index: 7, kind: input, shape index: {}]   ;;  %s622_s8 = inlined_call_operand.vmem [shape: f32[1,128], index: 8, kind: input, shape index: {}]   ;;  %s623_s9 = inlined_call_operand.hbm [shape: f32[32,128], index: 9, kind: output, shape index: {}]  }
   0x1   :  { %15 = vsyncpa [#allocation6], 0 }
   0x2   :  { %16 = vsyncpa [#allocation9], 0 }
   0x3   :  { %17 = vsyncpa [#allocation4], 0  ;;  %s35_s11 = sshll.u32 %s615_s1, 4  ;;  %s508_s12 = smov [#allocation5]   ;;  %s36_s11 = int_to_ptr.hbm [resolvable:$true] %s35_s11 }
   0x4   :  { %s37_s13 = sshll.u32 %s508_s12, 4  ;;  %s65_s16 = sshll.u32 %s619_s5, 4  ;;  %s38_s13 = int_to_ptr.vmem [resolvable:$true] %s37_s13  ;;  %s66_s16 = int_to_ptr.hbm [resolvable:$true] %s65_s16 }
   0x5   :  { %s509_s17 = smov 128   ;;  %s510_s18 = smov 8  }
   0x6   :  { %43 = dma.hbm_to_vmem [thread:$0]  %s36_s11, 2048, %s38_s13, [#allocation6], %s509_s17, %s509_s17, %s510_s18  }
   0x7   :  { %s511_s19 = smov [#allocation8]   ;;  %s22_s1 = sshll.u32 %s614_s0, 4  ;;  %s23_s1 = int_to_ptr.hbm [resolvable:$true] %s22_s1 }
   0x8   :  { %s67_s20 = sshll.u32 %s511_s19, 4  ;;  %s50_s24 = sshll.u32 %s617_s3, 4  ;;  %s68_s20 = int_to_ptr.vmem [resolvable:$true] %s67_s20  ;;  %s51_s24 = int_to_ptr.hbm [resolvable:$true] %s50_s24 }
   0x9   :  { %73 = dma.hbm_to_vmem [thread:$0]  %s66_s16, 2048, %s68_s20, [#allocation9], %s509_s17, %s509_s17, %s510_s18  }
   0xa   :  { %s512_s25 = smov [#allocation2]   ;;  %s513_s27 = smov [#allocation7]  }
   0xb   :  { %s24_s26 = sshll.u32 %s512_s25, 4  ;;  %s52_s0 = sshll.u32 %s513_s27, 4  ;;  %s25_s26 = int_to_ptr.vmem [resolvable:$true] %s24_s26  ;;  %s53_s0 = int_to_ptr.vmem [resolvable:$true] %s52_s0 }
   0xc   :  { %30 = dma.hbm_to_vmem [thread:$0]  %s23_s1, 512, %s25_s26, [#allocation3], %s509_s17, %s509_s17, %s510_s18  }
   0xd   :  { %s80_s30 = sshll.u32 %s621_s7, 4  ;;  %s514_s3 = smov [#allocation10]   ;;  %s81_s30 = int_to_ptr.hbm [resolvable:$true] %s80_s30 }
   0xe   :  { %58 = dma.hbm_to_vmem [thread:$0]  %s51_s24, 2048, %s53_s0, [#allocation6], %s509_s17, %s509_s17, %s510_s18  }
   0xf   :  { %s82_s10 = sshll.u32 %s514_s3, 4  ;;  %s83_s10 = int_to_ptr.vmem [resolvable:$true] %s82_s10 }
  0x10   :  { %88 = dma.hbm_to_vmem [thread:$0]  %s81_s30, 2048, %s83_s10, [#allocation9], %s509_s17, %s509_s17, %s510_s18  }
  0x11   :  { %500 = dma.done.wait [#allocation3], 512  }
  0x12   :  { %501 = vsyncadd [#allocation3], 4294966784 }
  0x13   :  { %502 = dma.done.wait [#allocation6], 4096  }
  0x14   :  { %503 = vsyncadd [#allocation6], 4294963200 }
  0x15   :  { %504 = dma.done.wait [#allocation9], 4096  }
  0x16   :  { %505 = vsyncadd [#allocation9], 4294963200  ;;  %v130_v0 = vld [vmem:[#allocation5 + $0x78] sm:$0xff]  ;;  %v129_v1 = vld [vmem:[#allocation5 + $0x70] sm:$0xff]  ;;  %s329_s21 = sshll.u32 %s623_s9, 4  ;;  %s330_s21 = int_to_ptr.hbm [resolvable:$true] %s329_s21 }
  0x17   :  { %135 = vmatpush.msra.mxu0 %v130_v0  ;;  %v128_v2 = vld [vmem:[#allocation5 + $0x68] sm:$0xff]  ;;  %v127_v3 = vld [vmem:[#allocation5 + $0x60] sm:$0xff]  ;;  %v126_v4 = vld [vmem:[#allocation5 + $0x58] sm:$0xff] }
  0x18   :  { %v125_v5 = vld [vmem:[#allocation5 + $0x50] sm:$0xff]  ;;  %v124_v6 = vld [vmem:[#allocation5 + $0x48] sm:$0xff]  ;;  %v123_v7 = vld [vmem:[#allocation5 + $0x40] sm:$0xff] }
  0x19   :  { %136 = vmatpush.msra.mxu0 %v129_v1  ;;  %v122_v8 = vld [vmem:[#allocation5 + $0x38] sm:$0xff]  ;;  %v121_v9 = vld [vmem:[#allocation5 + $0x30] sm:$0xff]  ;;  %v120_v10 = vld [vmem:[#allocation5 + $0x28] sm:$0xff] }
  0x1a   :  { %v119_v11 = vld [vmem:[#allocation5 + $0x20] sm:$0xff]  ;;  %v118_v12 = vld [vmem:[#allocation5 + $0x18] sm:$0xff]  ;;  %v117_v13 = vld [vmem:[#allocation5 + $0x10] sm:$0xff] }
  0x1b   :  { %137 = vmatpush.msra.mxu0 %v128_v2  ;;  %v183_v14 = vld [vmem:[#allocation7 + $0x78] sm:$0xff]  ;;  %v182_v15 = vld [vmem:[#allocation7 + $0x70] sm:$0xff]  ;;  %v116_v16 = vld [vmem:[#allocation5 + $0x8] sm:$0xff] }
  0x1c   :  { %188 = vmatpush.msra.mxu1 %v183_v14  ;;  %v181_v17 = vld [vmem:[#allocation7 + $0x68] sm:$0xff]  ;;  %v115_v18 = vld [vmem:[#allocation5] sm:$0xff]  ;;  %v179_v21 = vld [vmem:[#allocation7 + $0x58] sm:$0xff] }
  0x1d   :  { %138 = vmatpush.msra.mxu0 %v127_v3  ;;  %v180_v19 = vld [vmem:[#allocation7 + $0x60] sm:$0xff]  ;;  %v178_v22 = vld [vmem:[#allocation7 + $0x50] sm:$0xff]  ;;  %v177_v23 = vld [vmem:[#allocation7 + $0x48] sm:$0xff] }
  0x1e   :  { %189 = vmatpush.msra.mxu1 %v182_v15  ;;  %v111_v20 = vld [vmem:[#allocation2] sm:$0xff]  ;;  %v112_v25 = vld [vmem:[#allocation2 + $0x8] sm:$0xff]  ;;  %v175_v26 = vld [vmem:[#allocation7 + $0x38] sm:$0xff] }
  0x1f   :  { %139 = vmatpush.msra.mxu0 %v126_v4  ;;  %v176_v24 = vld [vmem:[#allocation7 + $0x40] sm:$0xff]  ;;  %v174_v27 = vld [vmem:[#allocation7 + $0x30] sm:$0xff]  ;;  %v173_v28 = vld [vmem:[#allocation7 + $0x28] sm:$0xff] }
  0x20   :  { %190 = vmatpush.msra.mxu1 %v181_v17  ;;  %v172_v29 = vld [vmem:[#allocation7 + $0x20] sm:$0xff]  ;;  %v113_v30 = vld [vmem:[#allocation2 + $0x10] sm:$0xff]  ;;  %v171_v31 = vld [vmem:[#allocation7 + $0x18] sm:$0xff] }
  0x21   :  { %140 = vmatpush.msra.mxu0 %v125_v5  ;;  %v114_v32 = vld [vmem:[#allocation2 + $0x18] sm:$0xff]  ;;  %v170_v33 = vld [vmem:[#allocation7 + $0x10] sm:$0xff]  ;;  %v169_v34 = vld [vmem:[#allocation7 + $0x8] sm:$0xff] }
  0x22   :  { %191 = vmatpush.msra.mxu1 %v180_v19  ;;  %v168_v35 = vld [vmem:[#allocation7] sm:$0xff]  ;;  %v232_v37 = vld [vmem:[#allocation8 + $0x78] sm:$0xff]  ;;  %v231_v38 = vld [vmem:[#allocation8 + $0x70] sm:$0xff] }
  0x23   :  { %141 = vmatpush.msra.mxu0 %v124_v6  ;;  %v352_v36 = vld [vmem:[%s616_s2] ss:$0 sm:$0xff]  ;;  %237 = vmatpush.msra.mxu2 %v232_v37  ;;  %v230_v39 = vld [vmem:[#allocation8 + $0x68] sm:$0xff]  ;;  %v228_v44 = vld [vmem:[#allocation8 + $0x58] sm:$0xff] }
  0x24   :  { %192 = vmatpush.msra.mxu1 %v179_v21  ;;  %v229_v42 = vld [vmem:[#allocation8 + $0x60] sm:$0xff]  ;;  %v227_v45 = vld [vmem:[#allocation8 + $0x50] sm:$0xff]  ;;  %v226_v46 = vld [vmem:[#allocation8 + $0x48] sm:$0xff] }
  0x25   :  { %142 = vmatpush.msra.mxu0 %v123_v7  ;;  %238 = vmatpush.msra.mxu2 %v231_v38  ;;  %v225_v49 = vld [vmem:[#allocation8 + $0x40] sm:$0xff]  ;;  %v224_v51 = vld [vmem:[#allocation8 + $0x38] sm:$0xff]  ;;  %v223_v52 = vld [vmem:[#allocation8 + $0x30] sm:$0xff] }
  0x26   :  { %193 = vmatpush.msra.mxu1 %v178_v22  ;;  %v222_v53 = vld [vmem:[#allocation8 + $0x28] sm:$0xff]  ;;  %v221_v56 = vld [vmem:[#allocation8 + $0x20] sm:$0xff]  ;;  %v220_v58 = vld [vmem:[#allocation8 + $0x18] sm:$0xff] }
  0x27   :  { %143 = vmatpush.msra.mxu0 %v122_v8  ;;  %239 = vmatpush.msra.mxu2 %v230_v39  ;;  %v219_v59 = vld [vmem:[#allocation8 + $0x10] sm:$0xff]  ;;  %v218_v63 = vld [vmem:[#allocation8 + $0x8] sm:$0xff]  ;;  %v217_v0 = vld [vmem:[#allocation8] sm:$0xff] }
  0x28   :  { %194 = vmatpush.msra.mxu1 %v177_v23  ;;  %v285_v1 = vld [vmem:[#allocation10 + $0x78] sm:$0xff]  ;;  %v284_v2 = vld [vmem:[#allocation10 + $0x70] sm:$0xff]  ;;  %v353_v3 = vld [vmem:[%s618_s4] ss:$0 sm:$0xff] }
  0x29   :  { %144 = vmatpush.msra.mxu0 %v121_v9  ;;  %240 = vmatpush.msra.mxu2 %v229_v42  ;;  %v283_v4 = vld [vmem:[#allocation10 + $0x68] sm:$0xff]  ;;  %v282_v5 = vld [vmem:[#allocation10 + $0x60] sm:$0xff]  ;;  %v281_v8 = vld [vmem:[#allocation10 + $0x58] sm:$0xff] }
  0x2a   :  { %195 = vmatpush.msra.mxu1 %v176_v24  ;;  %290 = vmatpush.msra.mxu3 %v285_v1  ;;  %v280_v9 = vld [vmem:[#allocation10 + $0x50] sm:$0xff]  ;;  %v277_v14 = vld [vmem:[#allocation10 + $0x38] sm:$0xff]  ;;  %v274_v17 = vld [vmem:[#allocation10 + $0x20] sm:$0xff] }
  0x2b   :  { %145 = vmatpush.msra.mxu0 %v120_v10  ;;  %241 = vmatpush.msra.mxu2 %v228_v44  ;;  %v279_v10 = vld [vmem:[#allocation10 + $0x48] sm:$0xff]  ;;  %v276_v15 = vld [vmem:[#allocation10 + $0x30] sm:$0xff]  ;;  %v355_v39 = vld [vmem:[%s622_s8] ss:$0 sm:$0xff] }
  0x2c   :  { %196 = vmatpush.msra.mxu1 %v175_v26  ;;  %291 = vmatpush.msra.mxu3 %v284_v2  ;;  %v272_v23 = vld [vmem:[#allocation10 + $0x10] sm:$0xff]  ;;  %v271_v24 = vld [vmem:[#allocation10 + $0x8] sm:$0xff]  ;;  %v354_v26 = vld [vmem:[%s620_s6] ss:$0 sm:$0xff]  ;;  %s515_s6 = smov [#allocation11]  }
  0x2d   :  { %146 = vmatpush.msra.mxu0 %v119_v11  ;;  %242 = vmatpush.msra.mxu2 %v227_v45  ;;  %v278_v11 = vld [vmem:[#allocation10 + $0x40] sm:$0xff]  ;;  %s327_s16 = sshll.u32 %s515_s6, 4  ;;  %s328_s16 = int_to_ptr.vmem [resolvable:$true] %s327_s16 }
  0x2e   :  { %197 = vmatpush.msra.mxu1 %v174_v27  ;;  %292 = vmatpush.msra.mxu3 %v283_v4 }
  0x2f   :  { %147 = vmatpush.msra.mxu0 %v118_v12  ;;  %243 = vmatpush.msra.mxu2 %v226_v46 }
  0x30   :  { %198 = vmatpush.msra.mxu1 %v173_v28  ;;  %293 = vmatpush.msra.mxu3 %v282_v5 }
  0x31   :  { %148 = vmatpush.msra.mxu0 %v117_v13  ;;  %244 = vmatpush.msra.mxu2 %v225_v49 }
  0x32   :  { %199 = vmatpush.msra.mxu1 %v172_v29  ;;  %294 = vmatpush.msra.mxu3 %v281_v8 }
  0x33   :  { %149 = vmatpush.msra.mxu0 %v116_v16  ;;  %245 = vmatpush.msra.mxu2 %v224_v51  ;;  %v275_v16 = vld [vmem:[#allocation10 + $0x28] sm:$0xff] }
  0x34   :  { %200 = vmatpush.msra.mxu1 %v171_v31  ;;  %295 = vmatpush.msra.mxu3 %v280_v9 }
  0x35   :  { %150 = vmatpush.msra.mxu0 %v115_v18  ;;  %246 = vmatpush.msra.mxu2 %v223_v52 }
  0x36   :  { %151 = vmatmul.f32.vlgmr.msra.gmra.mxu0 %v111_v20  ;;  %201 = vmatpush.msra.mxu1 %v170_v33  ;;  %v273_v20 = vld [vmem:[#allocation10 + $0x18] sm:$0xff] }
  0x37   :  { %247 = vmatpush.msra.mxu2 %v222_v53  ;;  %296 = vmatpush.msra.mxu3 %v279_v10 }
  0x38   :  { %202 = vmatpush.msra.mxu1 %v169_v34 }
  0x39   :  { %248 = vmatpush.msra.mxu2 %v221_v56  ;;  %297 = vmatpush.msra.mxu3 %v278_v11 }
  0x3a   :  { %203 = vmatpush.msra.mxu1 %v168_v35 }
  0x3b   :  { %249 = vmatpush.msra.mxu2 %v220_v58  ;;  %298 = vmatpush.msra.mxu3 %v277_v14 }
  0x3d   :  { %250 = vmatpush.msra.mxu2 %v219_v59  ;;  %299 = vmatpush.msra.mxu3 %v276_v15 }
  0x3e   :  { %154 = vmatmul.f32.gmra.mxu0 %v112_v25  ;;  %v270_v25 = vld [vmem:[#allocation10] sm:$0xff] }
  0x3f   :  { %251 = vmatpush.msra.mxu2 %v218_v63  ;;  %300 = vmatpush.msra.mxu3 %v275_v16 }
  0x41   :  { %252 = vmatpush.msra.mxu2 %v217_v0  ;;  %301 = vmatpush.msra.mxu3 %v274_v17 }
  0x43   :  { %302 = vmatpush.msra.mxu3 %v273_v20 }
  0x45   :  { %303 = vmatpush.msra.mxu3 %v272_v23 }
  0x46   :  { %157 = vmatmul.f32.gmra.mxu0 %v113_v30 }
  0x47   :  { %304 = vmatpush.msra.mxu3 %v271_v24 }
  0x49   :  { %305 = vmatpush.msra.mxu3 %v270_v25 }
  0x4e   :  { %160 = vmatmul.f32.gmra.mxu0 %v114_v32 }
  0xb3   :  { %v152_v40 = vpop.f32.mrf.mxu0 }
  0xb4   :  { %v153_v41 = vadd.f32 %v352_v36, %v152_v40 }
  0xb6   :  { %v164_v43 = vmax.f32 %v153_v41, 0.0 }
  0xb8   :  { %204 = vmatmul.f32.vlgmr.msra.gmra.mxu1 %v164_v43 }
  0xbb   :  { %v155_v47 = vpop.f32.mrf.mxu0 }
  0xbc   :  { %v156_v48 = vadd.f32 %v352_v36, %v155_v47 }
  0xbe   :  { %v165_v50 = vmax.f32 %v156_v48, 0.0 }
  0xc0   :  { %207 = vmatmul.f32.gmra.mxu1 %v165_v50 }
  0xc3   :  { %v158_v54 = vpop.f32.mrf.mxu0 }
  0xc4   :  { %v159_v55 = vadd.f32 %v352_v36, %v158_v54 }
  0xc6   :  { %v166_v57 = vmax.f32 %v159_v55, 0.0 }
  0xc8   :  { %210 = vmatmul.f32.gmra.mxu1 %v166_v57 }
  0xcb   :  { %v161_v60 = vpop.f32.mrf.mxu0 }
  0xcc   :  { %v162_v61 = vadd.f32 %v352_v36, %v161_v60 }
  0xce   :  { %v167_v62 = vmax.f32 %v162_v61, 0.0 }
  0xd0   :  { %213 = vmatmul.f32.gmra.mxu1 %v167_v62 }
 0x135   :  { %v205_v6 = vpop.f32.mrf.mxu1 }
 0x136   :  { %v206_v7 = vadd.f32 %v353_v3, %v205_v6 }
 0x138   :  { %253 = vmatmul.f32.vlgmr.msra.gmra.mxu2 %v206_v7 }
 0x13d   :  { %v208_v12 = vpop.f32.mrf.mxu1 }
 0x13e   :  { %v209_v13 = vadd.f32 %v353_v3, %v208_v12 }
 0x140   :  { %256 = vmatmul.f32.gmra.mxu2 %v209_v13 }
 0x145   :  { %v211_v18 = vpop.f32.mrf.mxu1 }
 0x146   :  { %v212_v19 = vadd.f32 %v353_v3, %v211_v18 }
 0x148   :  { %259 = vmatmul.f32.gmra.mxu2 %v212_v19 }
 0x14d   :  { %v214_v21 = vpop.f32.mrf.mxu1 }
 0x14e   :  { %v215_v22 = vadd.f32 %v353_v3, %v214_v21 }
 0x150   :  { %262 = vmatmul.f32.gmra.mxu2 %v215_v22 }
 0x1bb   :  { %v254_v27 = vpop.f32.mrf.mxu2 }
 0x1bc   :  { %v255_v28 = vadd.f32 %v354_v26, %v254_v27 }
 0x1be   :  { %v266_v29 = vmax.f32 %v255_v28, 0.0 }
 0x1c0   :  { %306 = vmatmul.f32.vlgmr.msra.gmra.mxu3 %v266_v29 }
 0x1c3   :  { %v257_v30 = vpop.f32.mrf.mxu2 }
 0x1c4   :  { %v258_v31 = vadd.f32 %v354_v26, %v257_v30 }
 0x1c6   :  { %v267_v32 = vmax.f32 %v258_v31, 0.0 }
 0x1c8   :  { %309 = vmatmul.f32.gmra.mxu3 %v267_v32 }
 0x1cb   :  { %v260_v33 = vpop.f32.mrf.mxu2 }
 0x1cc   :  { %v261_v34 = vadd.f32 %v354_v26, %v260_v33 }
 0x1ce   :  { %v268_v35 = vmax.f32 %v261_v34, 0.0 }
 0x1d0   :  { %312 = vmatmul.f32.gmra.mxu3 %v268_v35 }
 0x1d3   :  { %v263_v36 = vpop.f32.mrf.mxu2 }
 0x1d4   :  { %v264_v37 = vadd.f32 %v354_v26, %v263_v36 }
 0x1d6   :  { %v269_v38 = vmax.f32 %v264_v37, 0.0 }
 0x1d8   :  { %315 = vmatmul.f32.gmra.mxu3 %v269_v38 }
 0x243   :  { %v307_v40 = vpop.f32.mrf.mxu3 }
 0x244   :  { %v308_v41 = vadd.f32 %v355_v39, %v307_v40 }
 0x246   :  { %319 = vst [vmem:[#allocation11] sm:$0xff] %v308_v41 }
 0x24b   :  { %v310_v42 = vpop.f32.mrf.mxu3 }
 0x24c   :  { %v311_v43 = vadd.f32 %v355_v39, %v310_v42 }
 0x24e   :  { %320 = vst [vmem:[#allocation11 + $0x8] sm:$0xff] %v311_v43 }
 0x253   :  { %v313_v44 = vpop.f32.mrf.mxu3 }
 0x254   :  { %v314_v45 = vadd.f32 %v355_v39, %v313_v44 }
 0x256   :  { %321 = vst [vmem:[#allocation11 + $0x10] sm:$0xff] %v314_v45 }
 0x25b   :  { %v316_v46 = vpop.f32.mrf.mxu3 }
 0x25c   :  { %v317_v47 = vadd.f32 %v355_v39, %v316_v46 }
 0x25e   :  { %322 = vst [vmem:[#allocation11 + $0x18] sm:$0xff] %v317_v47 }
 0x25f   :  { %335 = dma.vmem_to_hbm [thread:$0]  %s328_s16, 512, %s330_s21, [#allocation4], %s509_s17, %s509_s17, %s510_s18  }
 0x260   :  { %506 = dma.done.wait [#allocation4], 512  }
 0x261   :  { %507 = vsyncadd [#allocation4], 4294966784 }
 0x262   :  { %340 = vsyncpa [#allocation3], 1 }
 0x263   :  { %341 = vsyncpa [#allocation6], 1 }
 0x264   :  { %342 = vsyncpa [#allocation9], 1 }
 0x265   :  { %343 = vsyncpa [#allocation4], 1 }

// kernel: tpu_custom_call.1
= control target key start
LH: loop header
LB: loop body
LE: loop exit
PB: predicated region body
PF: predicated region fallthrough
CT: control target
= control target key end

     0   :  { %14 = vsyncpa [#allocation3], 0  ;;  %s614_s0 = inlined_call_operand.hbm [shape: f32[32,128], index: 0, kind: input, shape index: {}]   ;;  %s615_s1 = inlined_call_operand.hbm [shape: f32[128,128], index: 1, kind: input, shape index: {}]   ;;  %s616_s2 = inlined_call_operand.vmem [shape: f32[1,128], index: 2, kind: input, shape index: {}]   ;;  %s617_s3 = inlined_call_operand.hbm [shape: f32[128,128], index: 3, kind: input, shape index: {}]   ;;  %s618_s4 = inlined_call_operand.vmem [shape: f32[1,128], index: 4, kind: input, shape index: {}]   ;;  %s619_s5 = inlined_call_operand.hbm [shape: f32[128,128], index: 5, kind: input, shape index: {}]   ;;  %s620_s6 = inlined_call_operand.vmem [shape: f32[1,128], index: 6, kind: input, shape index: {}]   ;;  %s621_s7 = inlined_call_operand.hbm [shape: f32[128,128], index: 7, kind: input, shape index: {}]   ;;  %s622_s8 = inlined_call_operand.vmem [shape: f32[1,128], index: 8, kind: input, shape index: {}]   ;;  %s623_s9 = inlined_call_operand.hbm [shape: f32[32,128], index: 9, kind: output, shape index: {}]  }
   0x1   :  { %15 = vsyncpa [#allocation6], 0 }
   0x2   :  { %16 = vsyncpa [#allocation9], 0 }
   0x3   :  { %17 = vsyncpa [#allocation4], 0  ;;  %s35_s11 = sshll.u32 %s615_s1, 4  ;;  %s508_s12 = smov [#allocation5]   ;;  %s36_s11 = int_to_ptr.hbm [resolvable:$true] %s35_s11 }
   0x4   :  { %s37_s13 = sshll.u32 %s508_s12, 4  ;;  %s65_s16 = sshll.u32 %s619_s5, 4  ;;  %s38_s13 = int_to_ptr.vmem [resolvable:$true] %s37_s13  ;;  %s66_s16 = int_to_ptr.hbm [resolvable:$true] %s65_s16 }
   0x5   :  { %s509_s17 = smov 128   ;;  %s510_s18 = smov 8  }
   0x6   :  { %43 = dma.hbm_to_vmem [thread:$0]  %s36_s11, 2048, %s38_s13, [#allocation6], %s509_s17, %s509_s17, %s510_s18  }
   0x7   :  { %s511_s19 = smov [#allocation8]   ;;  %s22_s1 = sshll.u32 %s614_s0, 4  ;;  %s23_s1 = int_to_ptr.hbm [resolvable:$true] %s22_s1 }
   0x8   :  { %s67_s20 = sshll.u32 %s511_s19, 4  ;;  %s50_s24 = sshll.u32 %s617_s3, 4  ;;  %s68_s20 = int_to_ptr.vmem [resolvable:$true] %s67_s20  ;;  %s51_s24 = int_to_ptr.hbm [resolvable:$true] %s50_s24 }
   0x9   :  { %73 = dma.hbm_to_vmem [thread:$0]  %s66_s16, 2048, %s68_s20, [#allocation9], %s509_s17, %s509_s17, %s510_s18  }
   0xa   :  { %s512_s25 = smov [#allocation2]   ;;  %s513_s27 = smov [#allocation7]  }
   0xb   :  { %s24_s26 = sshll.u32 %s512_s25, 4  ;;  %s52_s0 = sshll.u32 %s513_s27, 4  ;;  %s25_s26 = int_to_ptr.vmem [resolvable:$true] %s24_s26  ;;  %s53_s0 = int_to_ptr.vmem [resolvable:$true] %s52_s0 }
   0xc   :  { %30 = dma.hbm_to_vmem [thread:$0]  %s23_s1, 512, %s25_s26, [#allocation3], %s509_s17, %s509_s17, %s510_s18  }
   0xd   :  { %s80_s30 = sshll.u32 %s621_s7, 4  ;;  %s514_s3 = smov [#allocation10]   ;;  %s81_s30 = int_to_ptr.hbm [resolvable:$true] %s80_s30 }
   0xe   :  { %58 = dma.hbm_to_vmem [thread:$0]  %s51_s24, 2048, %s53_s0, [#allocation6], %s509_s17, %s509_s17, %s510_s18  }
   0xf   :  { %s82_s10 = sshll.u32 %s514_s3, 4  ;;  %s83_s10 = int_to_ptr.vmem [resolvable:$true] %s82_s10 }
  0x10   :  { %88 = dma.hbm_to_vmem [thread:$0]  %s81_s30, 2048, %s83_s10, [#allocation9], %s509_s17, %s509_s17, %s510_s18  }
  0x11   :  { %500 = dma.done.wait [#allocation3], 512  }
  0x12   :  { %501 = vsyncadd [#allocation3], 4294966784 }
  0x13   :  { %502 = dma.done.wait [#allocation6], 4096  }
  0x14   :  { %503 = vsyncadd [#allocation6], 4294963200 }
  0x15   :  { %504 = dma.done.wait [#allocation9], 4096  }
  0x16   :  { %505 = vsyncadd [#allocation9], 4294963200  ;;  %v130_v0 = vld [vmem:[#allocation5 + $0x78] sm:$0xff]  ;;  %v129_v1 = vld [vmem:[#allocation5 + $0x70] sm:$0xff]  ;;  %s329_s21 = sshll.u32 %s623_s9, 4  ;;  %s330_s21 = int_to_ptr.hbm [resolvable:$true] %s329_s21 }
  0x17   :  { %135 = vmatpush.msra.mxu0 %v130_v0  ;;  %v128_v2 = vld [vmem:[#allocation5 + $0x68] sm:$0xff]  ;;  %v127_v3 = vld [vmem:[#allocation5 + $0x60] sm:$0xff]  ;;  %v126_v4 = vld [vmem:[#allocation5 + $0x58] sm:$0xff] }
  0x18   :  { %v125_v5 = vld [vmem:[#allocation5 + $0x50] sm:$0xff]  ;;  %v124_v6 = vld [vmem:[#allocation5 + $0x48] sm:$0xff]  ;;  %v123_v7 = vld [vmem:[#allocation5 + $0x40] sm:$0xff] }
  0x19   :  { %136 = vmatpush.msra.mxu0 %v129_v1  ;;  %v122_v8 = vld [vmem:[#allocation5 + $0x38] sm:$0xff]  ;;  %v121_v9 = vld [vmem:[#allocation5 + $0x30] sm:$0xff]  ;;  %v120_v10 = vld [vmem:[#allocation5 + $0x28] sm:$0xff] }
  0x1a   :  { %v119_v11 = vld [vmem:[#allocation5 + $0x20] sm:$0xff]  ;;  %v118_v12 = vld [vmem:[#allocation5 + $0x18] sm:$0xff]  ;;  %v117_v13 = vld [vmem:[#allocation5 + $0x10] sm:$0xff] }
  0x1b   :  { %137 = vmatpush.msra.mxu0 %v128_v2  ;;  %v183_v14 = vld [vmem:[#allocation7 + $0x78] sm:$0xff]  ;;  %v182_v15 = vld [vmem:[#allocation7 + $0x70] sm:$0xff]  ;;  %v116_v16 = vld [vmem:[#allocation5 + $0x8] sm:$0xff] }
  0x1c   :  { %188 = vmatpush.msra.mxu1 %v183_v14  ;;  %v181_v17 = vld [vmem:[#allocation7 + $0x68] sm:$0xff]  ;;  %v115_v18 = vld [vmem:[#allocation5] sm:$0xff]  ;;  %v179_v21 = vld [vmem:[#allocation7 + $0x58] sm:$0xff] }
  0x1d   :  { %138 = vmatpush.msra.mxu0 %v127_v3  ;;  %v180_v19 = vld [vmem:[#allocation7 + $0x60] sm:$0xff]  ;;  %v178_v22 = vld [vmem:[#allocation7 + $0x50] sm:$0xff]  ;;  %v177_v23 = vld [vmem:[#allocation7 + $0x48] sm:$0xff] }
  0x1e   :  { %189 = vmatpush.msra.mxu1 %v182_v15  ;;  %v111_v20 = vld [vmem:[#allocation2] sm:$0xff]  ;;  %v112_v25 = vld [vmem:[#allocation2 + $0x8] sm:$0xff]  ;;  %v175_v26 = vld [vmem:[#allocation7 + $0x38] sm:$0xff] }
  0x1f   :  { %139 = vmatpush.msra.mxu0 %v126_v4  ;;  %v176_v24 = vld [vmem:[#allocation7 + $0x40] sm:$0xff]  ;;  %v174_v27 = vld [vmem:[#allocation7 + $0x30] sm:$0xff]  ;;  %v173_v28 = vld [vmem:[#allocation7 + $0x28] sm:$0xff] }
  0x20   :  { %190 = vmatpush.msra.mxu1 %v181_v17  ;;  %v172_v29 = vld [vmem:[#allocation7 + $0x20] sm:$0xff]  ;;  %v113_v30 = vld [vmem:[#allocation2 + $0x10] sm:$0xff]  ;;  %v171_v31 = vld [vmem:[#allocation7 + $0x18] sm:$0xff] }
  0x21   :  { %140 = vmatpush.msra.mxu0 %v125_v5  ;;  %v114_v32 = vld [vmem:[#allocation2 + $0x18] sm:$0xff]  ;;  %v170_v33 = vld [vmem:[#allocation7 + $0x10] sm:$0xff]  ;;  %v169_v34 = vld [vmem:[#allocation7 + $0x8] sm:$0xff] }
  0x22   :  { %191 = vmatpush.msra.mxu1 %v180_v19  ;;  %v168_v35 = vld [vmem:[#allocation7] sm:$0xff]  ;;  %v232_v37 = vld [vmem:[#allocation8 + $0x78] sm:$0xff]  ;;  %v231_v38 = vld [vmem:[#allocation8 + $0x70] sm:$0xff] }
  0x23   :  { %141 = vmatpush.msra.mxu0 %v124_v6  ;;  %v352_v36 = vld [vmem:[%s616_s2] ss:$0 sm:$0xff]  ;;  %237 = vmatpush.msra.mxu2 %v232_v37  ;;  %v230_v39 = vld [vmem:[#allocation8 + $0x68] sm:$0xff]  ;;  %v228_v44 = vld [vmem:[#allocation8 + $0x58] sm:$0xff] }
  0x24   :  { %192 = vmatpush.msra.mxu1 %v179_v21  ;;  %v229_v42 = vld [vmem:[#allocation8 + $0x60] sm:$0xff]  ;;  %v227_v45 = vld [vmem:[#allocation8 + $0x50] sm:$0xff]  ;;  %v226_v46 = vld [vmem:[#allocation8 + $0x48] sm:$0xff] }
  0x25   :  { %142 = vmatpush.msra.mxu0 %v123_v7  ;;  %238 = vmatpush.msra.mxu2 %v231_v38  ;;  %v225_v49 = vld [vmem:[#allocation8 + $0x40] sm:$0xff]  ;;  %v224_v51 = vld [vmem:[#allocation8 + $0x38] sm:$0xff]  ;;  %v223_v52 = vld [vmem:[#allocation8 + $0x30] sm:$0xff] }
  0x26   :  { %193 = vmatpush.msra.mxu1 %v178_v22  ;;  %v222_v53 = vld [vmem:[#allocation8 + $0x28] sm:$0xff]  ;;  %v221_v56 = vld [vmem:[#allocation8 + $0x20] sm:$0xff]  ;;  %v220_v58 = vld [vmem:[#allocation8 + $0x18] sm:$0xff] }
  0x27   :  { %143 = vmatpush.msra.mxu0 %v122_v8  ;;  %239 = vmatpush.msra.mxu2 %v230_v39  ;;  %v219_v59 = vld [vmem:[#allocation8 + $0x10] sm:$0xff]  ;;  %v218_v63 = vld [vmem:[#allocation8 + $0x8] sm:$0xff]  ;;  %v217_v0 = vld [vmem:[#allocation8] sm:$0xff] }
  0x28   :  { %194 = vmatpush.msra.mxu1 %v177_v23  ;;  %v285_v1 = vld [vmem:[#allocation10 + $0x78] sm:$0xff]  ;;  %v284_v2 = vld [vmem:[#allocation10 + $0x70] sm:$0xff]  ;;  %v353_v3 = vld [vmem:[%s618_s4] ss:$0 sm:$0xff] }
  0x29   :  { %144 = vmatpush.msra.mxu0 %v121_v9  ;;  %240 = vmatpush.msra.mxu2 %v229_v42  ;;  %v283_v4 = vld [vmem:[#allocation10 + $0x68] sm:$0xff]  ;;  %v282_v5 = vld [vmem:[#allocation10 + $0x60] sm:$0xff]  ;;  %v281_v8 = vld [vmem:[#allocation10 + $0x58] sm:$0xff] }
  0x2a   :  { %195 = vmatpush.msra.mxu1 %v176_v24  ;;  %290 = vmatpush.msra.mxu3 %v285_v1  ;;  %v280_v9 = vld [vmem:[#allocation10 + $0x50] sm:$0xff]  ;;  %v277_v14 = vld [vmem:[#allocation10 + $0x38] sm:$0xff]  ;;  %v274_v17 = vld [vmem:[#allocation10 + $0x20] sm:$0xff] }
  0x2b   :  { %145 = vmatpush.msra.mxu0 %v120_v10  ;;  %241 = vmatpush.msra.mxu2 %v228_v44  ;;  %v279_v10 = vld [vmem:[#allocation10 + $0x48] sm:$0xff]  ;;  %v276_v15 = vld [vmem:[#allocation10 + $0x30] sm:$0xff]  ;;  %v355_v39 = vld [vmem:[%s622_s8] ss:$0 sm:$0xff] }
  0x2c   :  { %196 = vmatpush.msra.mxu1 %v175_v26  ;;  %291 = vmatpush.msra.mxu3 %v284_v2  ;;  %v272_v23 = vld [vmem:[#allocation10 + $0x10] sm:$0xff]  ;;  %v271_v24 = vld [vmem:[#allocation10 + $0x8] sm:$0xff]  ;;  %v354_v26 = vld [vmem:[%s620_s6] ss:$0 sm:$0xff]  ;;  %s515_s6 = smov [#allocation11]  }
  0x2d   :  { %146 = vmatpush.msra.mxu0 %v119_v11  ;;  %242 = vmatpush.msra.mxu2 %v227_v45  ;;  %v278_v11 = vld [vmem:[#allocation10 + $0x40] sm:$0xff]  ;;  %s327_s16 = sshll.u32 %s515_s6, 4  ;;  %s328_s16 = int_to_ptr.vmem [resolvable:$true] %s327_s16 }
  0x2e   :  { %197 = vmatpush.msra.mxu1 %v174_v27  ;;  %292 = vmatpush.msra.mxu3 %v283_v4 }
  0x2f   :  { %147 = vmatpush.msra.mxu0 %v118_v12  ;;  %243 = vmatpush.msra.mxu2 %v226_v46 }
  0x30   :  { %198 = vmatpush.msra.mxu1 %v173_v28  ;;  %293 = vmatpush.msra.mxu3 %v282_v5 }
  0x31   :  { %148 = vmatpush.msra.mxu0 %v117_v13  ;;  %244 = vmatpush.msra.mxu2 %v225_v49 }
  0x32   :  { %199 = vmatpush.msra.mxu1 %v172_v29  ;;  %294 = vmatpush.msra.mxu3 %v281_v8 }
  0x33   :  { %149 = vmatpush.msra.mxu0 %v116_v16  ;;  %245 = vmatpush.msra.mxu2 %v224_v51  ;;  %v275_v16 = vld [vmem:[#allocation10 + $0x28] sm:$0xff] }
  0x34   :  { %200 = vmatpush.msra.mxu1 %v171_v31  ;;  %295 = vmatpush.msra.mxu3 %v280_v9 }
  0x35   :  { %150 = vmatpush.msra.mxu0 %v115_v18  ;;  %246 = vmatpush.msra.mxu2 %v223_v52 }
  0x36   :  { %151 = vmatmul.f32.vlgmr.msra.gmra.mxu0 %v111_v20  ;;  %201 = vmatpush.msra.mxu1 %v170_v33  ;;  %v273_v20 = vld [vmem:[#allocation10 + $0x18] sm:$0xff] }
  0x37   :  { %247 = vmatpush.msra.mxu2 %v222_v53  ;;  %296 = vmatpush.msra.mxu3 %v279_v10 }
  0x38   :  { %202 = vmatpush.msra.mxu1 %v169_v34 }
  0x39   :  { %248 = vmatpush.msra.mxu2 %v221_v56  ;;  %297 = vmatpush.msra.mxu3 %v278_v11 }
  0x3a   :  { %203 = vmatpush.msra.mxu1 %v168_v35 }
  0x3b   :  { %249 = vmatpush.msra.mxu2 %v220_v58  ;;  %298 = vmatpush.msra.mxu3 %v277_v14 }
  0x3d   :  { %250 = vmatpush.msra.mxu2 %v219_v59  ;;  %299 = vmatpush.msra.mxu3 %v276_v15 }
  0x3e   :  { %154 = vmatmul.f32.gmra.mxu0 %v112_v25  ;;  %v270_v25 = vld [vmem:[#allocation10] sm:$0xff] }
  0x3f   :  { %251 = vmatpush.msra.mxu2 %v218_v63  ;;  %300 = vmatpush.msra.mxu3 %v275_v16 }
  0x41   :  { %252 = vmatpush.msra.mxu2 %v217_v0  ;;  %301 = vmatpush.msra.mxu3 %v274_v17 }
  0x43   :  { %302 = vmatpush.msra.mxu3 %v273_v20 }
  0x45   :  { %303 = vmatpush.msra.mxu3 %v272_v23 }
  0x46   :  { %157 = vmatmul.f32.gmra.mxu0 %v113_v30 }
  0x47   :  { %304 = vmatpush.msra.mxu3 %v271_v24 }
  0x49   :  { %305 = vmatpush.msra.mxu3 %v270_v25 }
  0x4e   :  { %160 = vmatmul.f32.gmra.mxu0 %v114_v32 }
  0xb3   :  { %v152_v40 = vpop.f32.mrf.mxu0 }
  0xb4   :  { %v153_v41 = vadd.f32 %v352_v36, %v152_v40 }
  0xb6   :  { %v164_v43 = vmax.f32 %v153_v41, 0.0 }
  0xb8   :  { %204 = vmatmul.f32.vlgmr.msra.gmra.mxu1 %v164_v43 }
  0xbb   :  { %v155_v47 = vpop.f32.mrf.mxu0 }
  0xbc   :  { %v156_v48 = vadd.f32 %v352_v36, %v155_v47 }
  0xbe   :  { %v165_v50 = vmax.f32 %v156_v48, 0.0 }
  0xc0   :  { %207 = vmatmul.f32.gmra.mxu1 %v165_v50 }
  0xc3   :  { %v158_v54 = vpop.f32.mrf.mxu0 }
  0xc4   :  { %v159_v55 = vadd.f32 %v352_v36, %v158_v54 }
  0xc6   :  { %v166_v57 = vmax.f32 %v159_v55, 0.0 }
  0xc8   :  { %210 = vmatmul.f32.gmra.mxu1 %v166_v57 }
  0xcb   :  { %v161_v60 = vpop.f32.mrf.mxu0 }
  0xcc   :  { %v162_v61 = vadd.f32 %v352_v36, %v161_v60 }
  0xce   :  { %v167_v62 = vmax.f32 %v162_v61, 0.0 }
  0xd0   :  { %213 = vmatmul.f32.gmra.mxu1 %v167_v62 }
 0x135   :  { %v205_v6 = vpop.f32.mrf.mxu1 }
 0x136   :  { %v206_v7 = vadd.f32 %v353_v3, %v205_v6 }
 0x138   :  { %253 = vmatmul.f32.vlgmr.msra.gmra.mxu2 %v206_v7 }
 0x13d   :  { %v208_v12 = vpop.f32.mrf.mxu1 }
 0x13e   :  { %v209_v13 = vadd.f32 %v353_v3, %v208_v12 }
 0x140   :  { %256 = vmatmul.f32.gmra.mxu2 %v209_v13 }
 0x145   :  { %v211_v18 = vpop.f32.mrf.mxu1 }
 0x146   :  { %v212_v19 = vadd.f32 %v353_v3, %v211_v18 }
 0x148   :  { %259 = vmatmul.f32.gmra.mxu2 %v212_v19 }
 0x14d   :  { %v214_v21 = vpop.f32.mrf.mxu1 }
 0x14e   :  { %v215_v22 = vadd.f32 %v353_v3, %v214_v21 }
 0x150   :  { %262 = vmatmul.f32.gmra.mxu2 %v215_v22 }
 0x1bb   :  { %v254_v27 = vpop.f32.mrf.mxu2 }
 0x1bc   :  { %v255_v28 = vadd.f32 %v354_v26, %v254_v27 }
 0x1be   :  { %v266_v29 = vmax.f32 %v255_v28, 0.0 }
 0x1c0   :  { %306 = vmatmul.f32.vlgmr.msra.gmra.mxu3 %v266_v29 }
 0x1c3   :  { %v257_v30 = vpop.f32.mrf.mxu2 }
 0x1c4   :  { %v258_v31 = vadd.f32 %v354_v26, %v257_v30 }
 0x1c6   :  { %v267_v32 = vmax.f32 %v258_v31, 0.0 }
 0x1c8   :  { %309 = vmatmul.f32.gmra.mxu3 %v267_v32 }
 0x1cb   :  { %v260_v33 = vpop.f32.mrf.mxu2 }
 0x1cc   :  { %v261_v34 = vadd.f32 %v354_v26, %v260_v33 }
 0x1ce   :  { %v268_v35 = vmax.f32 %v261_v34, 0.0 }
 0x1d0   :  { %312 = vmatmul.f32.gmra.mxu3 %v268_v35 }
 0x1d3   :  { %v263_v36 = vpop.f32.mrf.mxu2 }
 0x1d4   :  { %v264_v37 = vadd.f32 %v354_v26, %v263_v36 }
 0x1d6   :  { %v269_v38 = vmax.f32 %v264_v37, 0.0 }
 0x1d8   :  { %315 = vmatmul.f32.gmra.mxu3 %v269_v38 }
 0x243   :  { %v307_v40 = vpop.f32.mrf.mxu3 }
 0x244   :  { %v308_v41 = vadd.f32 %v355_v39, %v307_v40 }
 0x246   :  { %319 = vst [vmem:[#allocation11] sm:$0xff] %v308_v41 }
 0x24b   :  { %v310_v42 = vpop.f32.mrf.mxu3 }
 0x24c   :  { %v311_v43 = vadd.f32 %v355_v39, %v310_v42 }
 0x24e   :  { %320 = vst [vmem:[#allocation11 + $0x8] sm:$0xff] %v311_v43 }
 0x253   :  { %v313_v44 = vpop.f32.mrf.mxu3 }
 0x254   :  { %v314_v45 = vadd.f32 %v355_v39, %v313_v44 }
 0x256   :  { %321 = vst [vmem:[#allocation11 + $0x10] sm:$0xff] %v314_v45 }
 0x25b   :  { %v316_v46 = vpop.f32.mrf.mxu3 }
 0x25c   :  { %v317_v47 = vadd.f32 %v355_v39, %v316_v46 }
 0x25e   :  { %322 = vst [vmem:[#allocation11 + $0x18] sm:$0xff] %v317_v47 }
 0x25f   :  { %335 = dma.vmem_to_hbm [thread:$0]  %s328_s16, 512, %s330_s21, [#allocation4], %s509_s17, %s509_s17, %s510_s18  }
 0x260   :  { %506 = dma.done.wait [#allocation4], 512  }
 0x261   :  { %507 = vsyncadd [#allocation4], 4294966784 }
 0x262   :  { %340 = vsyncpa [#allocation3], 1 }
 0x263   :  { %341 = vsyncpa [#allocation6], 1 }
 0x264   :  { %342 = vsyncpa [#allocation9], 1 }
 0x265   :  { %343 = vsyncpa [#allocation4], 1 }

</bundles_post_ra>
